<compile_context>
chip_gen: v5e
topology: v5e:2x2
jax: 0.10.0
libtpu: 0.0.40
codegen_flags: <defaults>
</compile_context>

<pallas_src>
import functools

import jax
import jax.numpy as jnp
from jax.experimental import pallas as pl
from jax.experimental.pallas import tpu as pltpu

LANE = 128          # lane width: weight fan_out / output dims padded to this
MAX_TILE_B = 512    # batch-tile cap (keeps VMEM tiny, amortizes step overhead)


def _round_up(x, m):
    return (x + m - 1) // m * m


def three_layer_kernel(x_ref, w1_ref, b1_ref, w2_ref, b2_ref, w3_ref, b3_ref,
                       o_ref):
    """Fused MLP forward on one batch tile.

    x_ref : (tile_b, D_in)          -- D_in unpadded (full-array last dim)
    wN_ref: (fan_in[_p], fan_out_p) -- pre-transposed, fan_out lane-padded
    bN_ref: (1, fan_out_p)
    o_ref : (tile_b, D_out_p)       -- lane-dense 128-padded output
    h1/h2 stay in VMEM/vregs for the whole body.
    """
    x = x_ref[...]
    h1 = jnp.dot(x, w1_ref[...], preferred_element_type=jnp.float32)
    h1 = jnp.maximum(h1 + b1_ref[...], 0.0)                      # clamp(min=0)
    h2 = jnp.dot(h1, w2_ref[...], preferred_element_type=jnp.float32)
    h2 = jnp.maximum(h2 + b2_ref[...], 0.0)                      # clamp(min=0)
    y = jnp.dot(h2, w3_ref[...], preferred_element_type=jnp.float32)
    o_ref[...] = (y + b3_ref[...]).astype(o_ref.dtype)


def pad_params(w1, b1, w2, b2, w3, b3):
    """Lane-pad feature dims ONCE (not per call).

    Weights come in already transposed as [fan_in, fan_out].
    w1's fan_in (= D_in) is left UNPADDED so x needs no feature padding in HBM;
    hidden/output fan_in/fan_out dims are zero-padded to LANE multiples.  The
    zero padding is exact through ReLU and the final layer.
    """
    def pad_w(w, pad_fan_in=True):
        fi, fo = w.shape
        fi_p = _round_up(fi, LANE) if pad_fan_in else fi
        return jnp.pad(w, ((0, fi_p - fi), (0, _round_up(fo, LANE) - fo)))

    def pad_b(b):
        (fo,) = b.shape
        return jnp.pad(b, (0, _round_up(fo, LANE) - fo)).reshape(1, -1)

    return (pad_w(w1, pad_fan_in=False), pad_b(b1),
            pad_w(w2), pad_b(b2),
            pad_w(w3), pad_b(b3))


@functools.partial(jax.jit, static_argnames=("d_out",))
def three_layer_net(x, w1p, b1p, w2p, b2p, w3p, b3p, *, d_out=1):
    """Forward pass of ThreeLayerNet.

    x:        [B, D_in] float32 (unpadded)
    w*p, b*p: lane-padded, pre-transposed params from `pad_params`
    returns   [B, d_out] float32
    """
    B, D_in = x.shape
    D_in_w, H1_p = w1p.shape
    _, H2_p = w2p.shape
    _, D_out_p = w3p.shape
    assert D_in_w == D_in

    # Large batch tile: one step for small B; multiple "parallel" steps for
    # large B (so both v7x TensorCores get work), each step still hundreds of
    # rows so per-step overhead / MXU fill-drain is amortized.
    tile_b = min(_round_up(B, 8), MAX_TILE_B)
    B_p = _round_up(B, tile_b)
    x_p = jnp.pad(x, ((0, B_p - B), (0, 0)))   # batch padding only, no feature pad

    grid = (B_p // tile_b,)

    y_p = pl.pallas_call(
        three_layer_kernel,
        out_shape=jax.ShapeDtypeStruct((B_p, D_out_p), x.dtype),
        grid_spec=pltpu.PrefetchScalarGridSpec(
            num_scalar_prefetch=0,
            grid=grid,
            in_specs=[
                # x: one batch tile per grid step (pipelined); last dim is the
                # full array dim (D_in), so no 128-lane padding is required.
                pl.BlockSpec((tile_b, D_in), lambda i: (i, 0)),
                # Weights / biases: same block every step -> VMEM-resident.
                pl.BlockSpec((D_in, H1_p), lambda i: (0, 0)),
                pl.BlockSpec((1, H1_p), lambda i: (0, 0)),
                pl.BlockSpec((H1_p, H2_p), lambda i: (0, 0)),
                pl.BlockSpec((1, H2_p), lambda i: (0, 0)),
                pl.BlockSpec((H2_p, D_out_p), lambda i: (0, 0)),
                pl.BlockSpec((1, D_out_p), lambda i: (0, 0)),
            ],
            # Output kept 128-lane padded -> unmasked lane-dense stores.
            out_specs=pl.BlockSpec((tile_b, D_out_p), lambda i: (i, 0)),
        ),
        compiler_params=pltpu.CompilerParams(
            # Batch axis is independent -> megacore sharding on v7x.
            dimension_semantics=("parallel",),
        ),
    )(x_p, w1p, b1p, w2p, b2p, w3p, b3p)

    # Drop batch padding and the zero-padded output lanes.
    return y_p[:B, :d_out]


if __name__ == "__main__":
    # Small shapes consistent with the module: x is [batch, D_in], D_out = 1.
    B, D_in, H1, H2, D_out = 64, 32, 64, 32, 1

    key = jax.random.PRNGKey(0)
    k = jax.random.split(key, 7)

    x = jax.random.normal(k[0], (B, D_in), dtype=jnp.float32)

    def init_linear(kw, kb, fan_in, fan_out):
        # nn.Linear-style uniform(-1/sqrt(fan_in), 1/sqrt(fan_in)) init,
        # stored pre-transposed as [fan_in, fan_out] (no weight.T at call time).
        bound = 1.0 / jnp.sqrt(jnp.float32(fan_in))
        w = jax.random.uniform(kw, (fan_in, fan_out), jnp.float32, -bound, bound)
        b = jax.random.uniform(kb, (fan_out,), jnp.float32, -bound, bound)
        return w, b

    w1, b1 = init_linear(k[1], k[2], D_in, H1)
    w2, b2 = init_linear(k[3], k[4], H1, H2)
    w3, b3 = init_linear(k[5], k[6], H2, D_out)

    # Pad/lay out parameters once (not per forward call).
    params_p = pad_params(w1, b1, w2, b2, w3, b3)

    y = three_layer_net(x, *params_p, d_out=D_out)
    y = jax.block_until_ready(y)

    # Pure-JAX f32 reference of the PyTorch forward.
    hp = jax.lax.Precision.HIGHEST
    h1 = jnp.maximum(jnp.dot(x, w1, precision=hp) + b1, 0.0)
    h2 = jnp.maximum(jnp.dot(h1, w2, precision=hp) + b2, 0.0)
    y_ref = jnp.dot(h2, w3, precision=hp) + b3

    assert y.shape == (B, D_out)
    assert jnp.allclose(y, y_ref, atol=1e-4, rtol=1e-4), (
        float(jnp.max(jnp.abs(y - y_ref))))

    print("KERNEL_OK")
</pallas_src>

<mosaic_0001>
module attributes {stable_mosaic.version = 11 : i64} {
  func.func @three_layer_kernel(%arg0: i32, %arg1: memref<64x32xf32, #tpu.memory_space<vmem>>, %arg2: memref<32x128xf32, #tpu.memory_space<vmem>>, %arg3: memref<1x128xf32, #tpu.memory_space<vmem>>, %arg4: memref<128x128xf32, #tpu.memory_space<vmem>>, %arg5: memref<1x128xf32, #tpu.memory_space<vmem>>, %arg6: memref<128x128xf32, #tpu.memory_space<vmem>>, %arg7: memref<1x128xf32, #tpu.memory_space<vmem>>, %arg8: memref<64x128xf32, #tpu.memory_space<vmem>>) attributes {dimension_semantics = [#tpu.dimension_semantics<parallel>], iteration_bounds = array<i64: 1>, scalar_prefetch = 0 : i64, scratch_operands = 0 : i64, tpu.core_type = #tpu.core_type<tc>, window_params = [{transform_indices = @transform_0, window_bounds = array<i64: 64, 32>}, {pipeline_mode = #tpu.pipeline_mode<synchronous>, transform_indices = @transform_1, window_bounds = array<i64: 32, 128>}, {pipeline_mode = #tpu.pipeline_mode<synchronous>, transform_indices = @transform_2, window_bounds = array<i64: 1, 128>}, {pipeline_mode = #tpu.pipeline_mode<synchronous>, transform_indices = @transform_3, window_bounds = array<i64: 128, 128>}, {pipeline_mode = #tpu.pipeline_mode<synchronous>, transform_indices = @transform_4, window_bounds = array<i64: 1, 128>}, {pipeline_mode = #tpu.pipeline_mode<synchronous>, transform_indices = @transform_5, window_bounds = array<i64: 128, 128>}, {pipeline_mode = #tpu.pipeline_mode<synchronous>, transform_indices = @transform_6, window_bounds = array<i64: 1, 128>}, {transform_indices = @transform_7, window_bounds = array<i64: 64, 128>}]} {
    %c0 = arith.constant 0 : index
    %c0_0 = arith.constant 0 : index
    %0 = vector.load %arg1[%c0, %c0_0] : memref<64x32xf32, #tpu.memory_space<vmem>>, vector<64x32xf32>
    %c0_1 = arith.constant 0 : index
    %c0_2 = arith.constant 0 : index
    %1 = vector.load %arg2[%c0_1, %c0_2] : memref<32x128xf32, #tpu.memory_space<vmem>>, vector<32x128xf32>
    %cst = arith.constant dense<0.000000e+00> : vector<64x128xf32>
    %2 = tpu.matmul %0, %1, %cst {dimension_numbers = #tpu.dot_dimension_numbers<[1], [0], [0], [1], [0, 0, 1, 1], [], []>} : vector<64x32xf32>, vector<32x128xf32>, vector<64x128xf32> -> vector<64x128xf32>
    %c0_3 = arith.constant 0 : index
    %c0_4 = arith.constant 0 : index
    %3 = vector.load %arg3[%c0_3, %c0_4] : memref<1x128xf32, #tpu.memory_space<vmem>>, vector<1x128xf32>
    %4 = vector.broadcast %3 : vector<1x128xf32> to vector<64x128xf32>
    %5 = arith.addf %2, %4 : vector<64x128xf32>
    %cst_5 = arith.constant 0.000000e+00 : f32
    %6 = vector.broadcast %cst_5 : f32 to vector<64x128xf32>
    %7 = arith.maximumf %5, %6 : vector<64x128xf32>
    %c0_6 = arith.constant 0 : index
    %c0_7 = arith.constant 0 : index
    %8 = vector.load %arg4[%c0_6, %c0_7] : memref<128x128xf32, #tpu.memory_space<vmem>>, vector<128x128xf32>
    %cst_8 = arith.constant dense<0.000000e+00> : vector<64x128xf32>
    %9 = tpu.matmul %7, %8, %cst_8 {dimension_numbers = #tpu.dot_dimension_numbers<[1], [0], [0], [1], [0, 0, 1, 1], [], []>} : vector<64x128xf32>, vector<128x128xf32>, vector<64x128xf32> -> vector<64x128xf32>
    %c0_9 = arith.constant 0 : index
    %c0_10 = arith.constant 0 : index
    %10 = vector.load %arg5[%c0_9, %c0_10] : memref<1x128xf32, #tpu.memory_space<vmem>>, vector<1x128xf32>
    %11 = vector.broadcast %10 : vector<1x128xf32> to vector<64x128xf32>
    %12 = arith.addf %9, %11 : vector<64x128xf32>
    %cst_11 = arith.constant 0.000000e+00 : f32
    %13 = vector.broadcast %cst_11 : f32 to vector<64x128xf32>
    %14 = arith.maximumf %12, %13 : vector<64x128xf32>
    %c0_12 = arith.constant 0 : index
    %c0_13 = arith.constant 0 : index
    %15 = vector.load %arg6[%c0_12, %c0_13] : memref<128x128xf32, #tpu.memory_space<vmem>>, vector<128x128xf32>
    %cst_14 = arith.constant dense<0.000000e+00> : vector<64x128xf32>
    %16 = tpu.matmul %14, %15, %cst_14 {dimension_numbers = #tpu.dot_dimension_numbers<[1], [0], [0], [1], [0, 0, 1, 1], [], []>} : vector<64x128xf32>, vector<128x128xf32>, vector<64x128xf32> -> vector<64x128xf32>
    %c0_15 = arith.constant 0 : index
    %c0_16 = arith.constant 0 : index
    %17 = vector.load %arg7[%c0_15, %c0_16] : memref<1x128xf32, #tpu.memory_space<vmem>>, vector<1x128xf32>
    %18 = vector.broadcast %17 : vector<1x128xf32> to vector<64x128xf32>
    %19 = arith.addf %16, %18 : vector<64x128xf32>
    %c0_17 = arith.constant 0 : index
    %c0_18 = arith.constant 0 : index
    %20 = vector.load %arg8[%c0_17, %c0_18] : memref<64x128xf32, #tpu.memory_space<vmem>>, vector<64x128xf32>
    tpu.vector_store %arg8[%c0_17, %c0_18], %19 {strides = array<i32>} : memref<64x128xf32, #tpu.memory_space<vmem>>, vector<64x128xf32>,
    return
  }
  func.func @transform_0(%arg0: i32) -> (i32, i32) {
    %c0_i32 = arith.constant 0 : i32
    %c0_i32_0 = arith.constant 0 : i32
    return %arg0, %c0_i32 : i32, i32
  }
  func.func @transform_1(%arg0: i32) -> (i32, i32) {
    %c0_i32 = arith.constant 0 : i32
    %c0_i32_0 = arith.constant 0 : i32
    %c0_i32_1 = arith.constant 0 : i32
    return %c0_i32, %c0_i32_0 : i32, i32
  }
  func.func @transform_2(%arg0: i32) -> (i32, i32) {
    %c0_i32 = arith.constant 0 : i32
    %c0_i32_0 = arith.constant 0 : i32
    %c0_i32_1 = arith.constant 0 : i32
    return %c0_i32, %c0_i32_0 : i32, i32
  }
  func.func @transform_3(%arg0: i32) -> (i32, i32) {
    %c0_i32 = arith.constant 0 : i32
    %c0_i32_0 = arith.constant 0 : i32
    %c0_i32_1 = arith.constant 0 : i32
    return %c0_i32, %c0_i32_0 : i32, i32
  }
  func.func @transform_4(%arg0: i32) -> (i32, i32) {
    %c0_i32 = arith.constant 0 : i32
    %c0_i32_0 = arith.constant 0 : i32
    %c0_i32_1 = arith.constant 0 : i32
    return %c0_i32, %c0_i32_0 : i32, i32
  }
  func.func @transform_5(%arg0: i32) -> (i32, i32) {
    %c0_i32 = arith.constant 0 : i32
    %c0_i32_0 = arith.constant 0 : i32
    %c0_i32_1 = arith.constant 0 : i32
    return %c0_i32, %c0_i32_0 : i32, i32
  }
  func.func @transform_6(%arg0: i32) -> (i32, i32) {
    %c0_i32 = arith.constant 0 : i32
    %c0_i32_0 = arith.constant 0 : i32
    %c0_i32_1 = arith.constant 0 : i32
    return %c0_i32, %c0_i32_0 : i32, i32
  }
  func.func @transform_7(%arg0: i32) -> (i32, i32) {
    %c0_i32 = arith.constant 0 : i32
    %c0_i32_0 = arith.constant 0 : i32
    return %arg0, %c0_i32 : i32, i32
  }
}

</mosaic_0001>

<bundles_post_ra>
// kernel: three_layer_net.1
= control target key start
LH: loop header
LB: loop body
LE: loop exit
PB: predicated region body
PF: predicated region fallthrough
CT: control target
= control target key end

     0   :  { %12 = vsyncpa [#allocation3], 0  ;;  %s528_s0 = inlined_call_operand.vmem [shape: f32[64,32], index: 0, kind: input, shape index: {}]   ;;  %s529_s1 = inlined_call_operand.vmem [shape: f32[32,128], index: 1, kind: input, shape index: {}]   ;;  %s530_s2 = inlined_call_operand.vmem [shape: f32[1,128], index: 2, kind: input, shape index: {}]   ;;  %s531_s3 = inlined_call_operand.hbm [shape: f32[128,128], index: 3, kind: input, shape index: {}]   ;;  %s532_s4 = inlined_call_operand.vmem [shape: f32[1,128], index: 4, kind: input, shape index: {}]   ;;  %s533_s5 = inlined_call_operand.hbm [shape: f32[128,128], index: 5, kind: input, shape index: {}]   ;;  %s534_s6 = inlined_call_operand.vmem [shape: f32[1,128], index: 6, kind: input, shape index: {}]   ;;  %s535_s7 = inlined_call_operand.vmem [shape: f32[64,128], index: 7, kind: output, shape index: {}]  }
   0x1   :  { %s24_s26 = sshll.u32 %s531_s3, 4  ;;  %s25_s26 = int_to_ptr.hbm [resolvable:$true] %s24_s26 }
   0x2   :  { %13 = vsyncpa [#allocation5], 0  ;;  %s391_s27 = smov [#allocation2]   ;;  %s39_s8 = sshll.u32 %s533_s5, 4  ;;  %s40_s8 = int_to_ptr.hbm [resolvable:$true] %s39_s8 }
   0x3   :  { %s26_s28 = sshll.u32 %s391_s27, 4  ;;  %s392_s9 = smov 128   ;;  %s27_s28 = int_to_ptr.vmem [resolvable:$true] %s26_s28 }
   0x4   :  { %s393_s10 = smov 8   ;;  %s394_s11 = smov [#allocation4]  }
   0x5   :  { %32 = dma.hbm_to_vmem [thread:$0]  %s25_s26, 2048, %s27_s28, [#allocation3], %s392_s9, %s392_s9, %s393_s10  }
   0x6   :  { %s41_s12 = sshll.u32 %s394_s11, 4  ;;  %s42_s12 = int_to_ptr.vmem [resolvable:$true] %s41_s12 }
   0x7   :  { %47 = dma.hbm_to_vmem [thread:$0]  %s40_s8, 2048, %s42_s12, [#allocation5], %s392_s9, %s392_s9, %s393_s10  }
   0x8   :  { %387 = dma.done.wait [#allocation3], 2048  }
   0x9   :  { %388 = vsyncadd [#allocation3], 4294965248 }
   0xa   :  { %389 = dma.done.wait [#allocation5], 2048  }
   0xb   :  { %390 = vsyncadd [#allocation5], 4294965248  ;;  %v69_v0 = vld [vmem:[%s529_s1 + $0x18] sm:$0xff]  ;;  %v68_v1 = vld [vmem:[%s529_s1 + $0x10] sm:$0xff]  ;;  %vm74_vm0 = vcmask 261120  }
   0xc   :  { %111 = vmatpush.msra.mxu0 %v69_v0  ;;  %v67_v2 = vld [vmem:[%s529_s1 + $0x8] sm:$0xff]  ;;  %v66_v3 = vld [vmem:[%s529_s1] sm:$0xff]  ;;  %v60_v6 = vld [vmem:[%s528_s0 + $0x10] sm:$0xff] }
   0xd   :  { %v58_v4 = vld [vmem:[%s528_s0] sm:$0xff]  ;;  %v59_v5 = vld [vmem:[%s528_s0 + $0x8] sm:$0xff]  ;;  %v61_v7 = vld [vmem:[%s528_s0 + $0x18] sm:$0xff] }
   0xe   :  { %112 = vmatpush.msra.mxu0 %v68_v1  ;;  %v163_v8 = vld [vmem:[#allocation2 + $0x78] sm:$0xff]  ;;  %v162_v9 = vld [vmem:[#allocation2 + $0x70] sm:$0xff]  ;;  %v161_v10 = vld [vmem:[#allocation2 + $0x68] sm:$0xff] }
   0xf   :  { %168 = vmatpush.msra.mxu1 %v163_v8  ;;  %300 = vmatpush.msra.mxu3 %v163_v8  ;;  %v160_v11 = vld [vmem:[#allocation2 + $0x60] sm:$0xff]  ;;  %v159_v13 = vld [vmem:[#allocation2 + $0x58] sm:$0xff]  ;;  %v158_v14 = vld [vmem:[#allocation2 + $0x50] sm:$0xff] }
  0x10   :  { %113 = vmatpush.msra.mxu0 %v67_v2  ;;  %v62_v12 = vld [vmem:[%s528_s0 + $0x20] sm:$0xff]  ;;  %v157_v15 = vld [vmem:[#allocation2 + $0x48] sm:$0xff]  ;;  %v155_v18 = vld [vmem:[#allocation2 + $0x38] sm:$0xff] }
  0x11   :  { %169 = vmatpush.msra.mxu1 %v162_v9  ;;  %301 = vmatpush.msra.mxu3 %v162_v9  ;;  %v156_v16 = vld [vmem:[#allocation2 + $0x40] sm:$0xff]  ;;  %v63_v17 = vld [vmem:[%s528_s0 + $0x28] sm:$0xff]  ;;  %v154_v19 = vld [vmem:[#allocation2 + $0x30] sm:$0xff] }
  0x12   :  { %114 = vmatpush.msra.mxu0 %v66_v3  ;;  %v153_v20 = vld [vmem:[#allocation2 + $0x28] sm:$0xff]  ;;  %v152_v21 = vld [vmem:[#allocation2 + $0x20] sm:$0xff]  ;;  %v64_v22 = vld [vmem:[%s528_s0 + $0x30] sm:$0xff] }
  0x13   :  { %292 = vmatmul.msk.f32.vlgmr.msra.gmra.mxu0 %vm74_vm0, %v58_v4  ;;  %170 = vmatpush.msra.mxu1 %v161_v10  ;;  %v151_v23 = vld [vmem:[#allocation2 + $0x18] sm:$0xff]  ;;  %v150_v25 = vld [vmem:[#allocation2 + $0x10] sm:$0xff]  ;;  %v149_v26 = vld [vmem:[#allocation2 + $0x8] sm:$0xff] }
  0x14   :  { %302 = vmatpush.msra.mxu3 %v161_v10  ;;  %v65_v24 = vld [vmem:[%s528_s0 + $0x38] sm:$0xff]  ;;  %v148_v27 = vld [vmem:[#allocation2] sm:$0xff]  ;;  %v231_v42 = vld [vmem:[#allocation4 + $0x70] sm:$0xff] }
  0x15   :  { %171 = vmatpush.msra.mxu1 %v160_v11  ;;  %v488_v28 = vld [vmem:[%s530_s2] ss:$0 sm:$0xff]  ;;  %v232_v41 = vld [vmem:[#allocation4 + $0x78] sm:$0xff]  ;;  %v230_v43 = vld [vmem:[#allocation4 + $0x68] sm:$0xff] }
  0x16   :  { %303 = vmatpush.msra.mxu3 %v160_v11  ;;  %237 = vmatpush.msra.mxu2 %v232_v41  ;;  %v229_v46 = vld [vmem:[#allocation4 + $0x60] sm:$0xff]  ;;  %v228_v48 = vld [vmem:[#allocation4 + $0x58] sm:$0xff]  ;;  %v227_v49 = vld [vmem:[#allocation4 + $0x50] sm:$0xff] }
  0x17   :  { %172 = vmatpush.msra.mxu1 %v159_v13  ;;  %v226_v50 = vld [vmem:[#allocation4 + $0x48] sm:$0xff]  ;;  %v225_v53 = vld [vmem:[#allocation4 + $0x40] sm:$0xff]  ;;  %v224_v55 = vld [vmem:[#allocation4 + $0x38] sm:$0xff] }
  0x18   :  { %304 = vmatpush.msra.mxu3 %v159_v13  ;;  %238 = vmatpush.msra.mxu2 %v231_v42  ;;  %v223_v56 = vld [vmem:[#allocation4 + $0x30] sm:$0xff]  ;;  %v222_v57 = vld [vmem:[#allocation4 + $0x28] sm:$0xff]  ;;  %v221_v60 = vld [vmem:[#allocation4 + $0x20] sm:$0xff] }
  0x19   :  { %173 = vmatpush.msra.mxu1 %v158_v14  ;;  %v220_v62 = vld [vmem:[#allocation4 + $0x18] sm:$0xff]  ;;  %v219_v2 = vld [vmem:[#allocation4 + $0x10] sm:$0xff]  ;;  %v218_v3 = vld [vmem:[#allocation4 + $0x8] sm:$0xff] }
  0x1a   :  { %305 = vmatpush.msra.mxu3 %v158_v14  ;;  %239 = vmatpush.msra.mxu2 %v230_v43  ;;  %v217_v4 = vld [vmem:[#allocation4] sm:$0xff] }
  0x1b   :  { %293 = vmatmul.msk.f32.gmra.mxu0 %vm74_vm0, %v59_v5  ;;  %174 = vmatpush.msra.mxu1 %v157_v15  ;;  %v337_v5 = vld [vmem:[%s532_s4] ss:$0 sm:$0xff] }
  0x1c   :  { %306 = vmatpush.msra.mxu3 %v157_v15  ;;  %240 = vmatpush.msra.mxu2 %v229_v46 }
  0x1d   :  { %175 = vmatpush.msra.mxu1 %v156_v16 }
  0x1e   :  { %307 = vmatpush.msra.mxu3 %v156_v16  ;;  %241 = vmatpush.msra.mxu2 %v228_v48 }
  0x1f   :  { %176 = vmatpush.msra.mxu1 %v155_v18 }
  0x20   :  { %308 = vmatpush.msra.mxu3 %v155_v18  ;;  %242 = vmatpush.msra.mxu2 %v227_v49 }
  0x21   :  { %177 = vmatpush.msra.mxu1 %v154_v19 }
  0x22   :  { %309 = vmatpush.msra.mxu3 %v154_v19  ;;  %243 = vmatpush.msra.mxu2 %v226_v50 }
  0x23   :  { %294 = vmatmul.msk.f32.gmra.mxu0 %vm74_vm0, %v60_v6  ;;  %178 = vmatpush.msra.mxu1 %v153_v20 }
  0x24   :  { %310 = vmatpush.msra.mxu3 %v153_v20  ;;  %244 = vmatpush.msra.mxu2 %v225_v53 }
  0x25   :  { %179 = vmatpush.msra.mxu1 %v152_v21 }
  0x26   :  { %311 = vmatpush.msra.mxu3 %v152_v21  ;;  %245 = vmatpush.msra.mxu2 %v224_v55 }
  0x27   :  { %180 = vmatpush.msra.mxu1 %v151_v23 }
  0x28   :  { %312 = vmatpush.msra.mxu3 %v151_v23  ;;  %246 = vmatpush.msra.mxu2 %v223_v56 }
  0x29   :  { %181 = vmatpush.msra.mxu1 %v150_v25 }
  0x2a   :  { %313 = vmatpush.msra.mxu3 %v150_v25  ;;  %247 = vmatpush.msra.mxu2 %v222_v57 }
  0x2b   :  { %295 = vmatmul.msk.f32.gmra.mxu0 %vm74_vm0, %v61_v7  ;;  %182 = vmatpush.msra.mxu1 %v149_v26 }
  0x2c   :  { %314 = vmatpush.msra.mxu3 %v149_v26  ;;  %248 = vmatpush.msra.mxu2 %v221_v60 }
  0x2d   :  { %183 = vmatpush.msra.mxu1 %v148_v27 }
  0x2e   :  { %315 = vmatpush.msra.mxu3 %v148_v27  ;;  %249 = vmatpush.msra.mxu2 %v220_v62 }
  0x30   :  { %316 = vmatpush.msrb.mxu3 %v232_v41  ;;  %250 = vmatpush.msra.mxu2 %v219_v2 }
  0x32   :  { %317 = vmatpush.msrb.mxu3 %v231_v42  ;;  %251 = vmatpush.msra.mxu2 %v218_v3 }
  0x33   :  { %296 = vmatmul.msk.f32.gmra.mxu0 %vm74_vm0, %v62_v12 }
  0x34   :  { %318 = vmatpush.msrb.mxu3 %v230_v43  ;;  %252 = vmatpush.msra.mxu2 %v217_v4 }
  0x36   :  { %319 = vmatpush.msrb.mxu3 %v229_v46 }
  0x38   :  { %320 = vmatpush.msrb.mxu3 %v228_v48 }
  0x3a   :  { %321 = vmatpush.msrb.mxu3 %v227_v49 }
  0x3b   :  { %297 = vmatmul.msk.f32.gmra.mxu0 %vm74_vm0, %v63_v17 }
  0x3c   :  { %322 = vmatpush.msrb.mxu3 %v226_v50 }
  0x3e   :  { %323 = vmatpush.msrb.mxu3 %v225_v53 }
  0x40   :  { %324 = vmatpush.msrb.mxu3 %v224_v55 }
  0x42   :  { %325 = vmatpush.msrb.mxu3 %v223_v56 }
  0x43   :  { %298 = vmatmul.msk.f32.gmra.mxu0 %vm74_vm0, %v64_v22 }
  0x44   :  { %326 = vmatpush.msrb.mxu3 %v222_v57 }
  0x46   :  { %327 = vmatpush.msrb.mxu3 %v221_v60 }
  0x48   :  { %328 = vmatpush.msrb.mxu3 %v220_v62 }
  0x4a   :  { %329 = vmatpush.msrb.mxu3 %v219_v2 }
  0x4b   :  { %299 = vmatmul.msk.f32.gmra.mxu0 %vm74_vm0, %v65_v24 }
  0x4c   :  { %330 = vmatpush.msrb.mxu3 %v218_v3 }
  0x4e   :  { %331 = vmatpush.msrb.mxu3 %v217_v4 }
  0x90   :  { %v116_v29 = vpop.f32.mrf.mxu0 }
  0x91   :  { %v117_v30 = vadd.f32 %v488_v28, %v116_v29 }
  0x93   :  { %v140_v31 = vmax.f32 %v117_v30, 0.0  ;;  %v338_v30 = vld [vmem:[%s534_s6] ss:$0 sm:$0xff] }
  0x95   :  { %184 = vmatmul.f32.vlgmr.msra.gmra.mxu1 %v140_v31 }
  0x98   :  { %v119_v32 = vpop.f32.mrf.mxu0 }
  0x99   :  { %v120_v33 = vadd.f32 %v488_v28, %v119_v32 }
  0x9b   :  { %v141_v34 = vmax.f32 %v120_v33, 0.0 }
  0x9d   :  { %187 = vmatmul.f32.gmra.mxu1 %v141_v34 }
  0xa0   :  { %v122_v35 = vpop.f32.mrf.mxu0 }
  0xa1   :  { %v123_v36 = vadd.f32 %v488_v28, %v122_v35 }
  0xa3   :  { %v142_v37 = vmax.f32 %v123_v36, 0.0 }
  0xa5   :  { %190 = vmatmul.f32.gmra.mxu1 %v142_v37 }
  0xa8   :  { %v125_v38 = vpop.f32.mrf.mxu0 }
  0xa9   :  { %v126_v39 = vadd.f32 %v488_v28, %v125_v38 }
  0xab   :  { %v143_v40 = vmax.f32 %v126_v39, 0.0 }
  0xad   :  { %193 = vmatmul.f32.gmra.mxu1 %v143_v40 }
  0xb0   :  { %v128_v44 = vpop.f32.mrf.mxu0 }
  0xb1   :  { %v129_v45 = vadd.f32 %v488_v28, %v128_v44 }
  0xb3   :  { %v144_v47 = vmax.f32 %v129_v45, 0.0 }
  0xb5   :  { %196 = vmatmul.f32.gmra.mxu1 %v144_v47 }
  0xb8   :  { %v131_v51 = vpop.f32.mrf.mxu0 }
  0xb9   :  { %v132_v52 = vadd.f32 %v488_v28, %v131_v51 }
  0xbb   :  { %v145_v54 = vmax.f32 %v132_v52, 0.0 }
  0xbd   :  { %199 = vmatmul.f32.gmra.mxu1 %v145_v54 }
  0xc0   :  { %v134_v58 = vpop.f32.mrf.mxu0 }
  0xc1   :  { %v135_v59 = vadd.f32 %v488_v28, %v134_v58 }
  0xc3   :  { %v146_v61 = vmax.f32 %v135_v59, 0.0 }
  0xc5   :  { %202 = vmatmul.f32.vlgmr.msra.gmra.mxu3 %v146_v61 }
  0xc8   :  { %v137_v63 = vpop.f32.mrf.mxu0 }
  0xc9   :  { %v138_v0 = vadd.f32 %v488_v28, %v137_v63 }
  0xcb   :  { %v147_v1 = vmax.f32 %v138_v0, 0.0 }
  0xcd   :  { %205 = vmatmul.f32.gmra.mxu3 %v147_v1 }
 0x112   :  { %v185_v6 = vpop.f32.mrf.mxu1 }
 0x113   :  { %v186_v7 = vadd.f32 %v337_v5, %v185_v6 }
 0x115   :  { %v209_v8 = vmax.f32 %v186_v7, 0.0 }
 0x117   :  { %253 = vmatmul.f32.vlgmr.msra.gmra.mxu2 %v209_v8 }
 0x11a   :  { %v188_v9 = vpop.f32.mrf.mxu1 }
 0x11b   :  { %v189_v10 = vadd.f32 %v337_v5, %v188_v9 }
 0x11d   :  { %v210_v11 = vmax.f32 %v189_v10, 0.0 }
 0x11f   :  { %256 = vmatmul.f32.gmra.mxu2 %v210_v11 }
 0x122   :  { %v191_v12 = vpop.f32.mrf.mxu1 }
 0x123   :  { %v192_v13 = vadd.f32 %v337_v5, %v191_v12 }
 0x125   :  { %v211_v14 = vmax.f32 %v192_v13, 0.0 }
 0x127   :  { %259 = vmatmul.f32.gmra.mxu2 %v211_v14 }
 0x12a   :  { %v194_v15 = vpop.f32.mrf.mxu1 }
 0x12b   :  { %v195_v16 = vadd.f32 %v337_v5, %v194_v15 }
 0x12d   :  { %v212_v17 = vmax.f32 %v195_v16, 0.0 }
 0x12f   :  { %262 = vmatmul.f32.gmra.mxu2 %v212_v17 }
 0x132   :  { %v197_v18 = vpop.f32.mrf.mxu1 }
 0x133   :  { %v198_v19 = vadd.f32 %v337_v5, %v197_v18 }
 0x135   :  { %v213_v20 = vmax.f32 %v198_v19, 0.0 }
 0x137   :  { %265 = vmatmul.f32.gmra.mxu2 %v213_v20 }
 0x13a   :  { %v200_v21 = vpop.f32.mrf.mxu1 }
 0x13b   :  { %v201_v22 = vadd.f32 %v337_v5, %v200_v21 }
 0x13d   :  { %v214_v23 = vmax.f32 %v201_v22, 0.0 }
 0x13f   :  { %268 = vmatmul.f32.gmra.mxu2 %v214_v23 }
 0x148   :  { %v203_v24 = vpop.f32.mrf.mxu3 }
 0x149   :  { %v204_v25 = vadd.f32 %v337_v5, %v203_v24 }
 0x14b   :  { %v215_v26 = vmax.f32 %v204_v25, 0.0 }
 0x14d   :  { %271 = vmatmul.f32.vlgmr.msrb.gmra.mxu3 %v215_v26 }
 0x150   :  { %v206_v27 = vpop.f32.mrf.mxu3 }
 0x151   :  { %v207_v28 = vadd.f32 %v337_v5, %v206_v27 }
 0x153   :  { %v216_v29 = vmax.f32 %v207_v28, 0.0 }
 0x155   :  { %274 = vmatmul.f32.gmra.mxu3 %v216_v29 }
 0x19a   :  { %v254_v31 = vpop.f32.mrf.mxu2 }
 0x19b   :  { %v255_v32 = vadd.f32 %v338_v30, %v254_v31 }
 0x19d   :  { %278 = vst [vmem:[%s535_s7] sm:$0xff] %v255_v32 }
 0x1a2   :  { %v257_v33 = vpop.f32.mrf.mxu2 }
 0x1a3   :  { %v258_v34 = vadd.f32 %v338_v30, %v257_v33 }
 0x1a5   :  { %279 = vst [vmem:[%s535_s7 + $0x8] sm:$0xff] %v258_v34 }
 0x1aa   :  { %v260_v35 = vpop.f32.mrf.mxu2 }
 0x1ab   :  { %v261_v36 = vadd.f32 %v338_v30, %v260_v35 }
 0x1ad   :  { %280 = vst [vmem:[%s535_s7 + $0x10] sm:$0xff] %v261_v36 }
 0x1b2   :  { %v263_v37 = vpop.f32.mrf.mxu2 }
 0x1b3   :  { %v264_v38 = vadd.f32 %v338_v30, %v263_v37 }
 0x1b5   :  { %281 = vst [vmem:[%s535_s7 + $0x18] sm:$0xff] %v264_v38 }
 0x1ba   :  { %v266_v39 = vpop.f32.mrf.mxu2 }
 0x1bb   :  { %v267_v40 = vadd.f32 %v338_v30, %v266_v39 }
 0x1bd   :  { %282 = vst [vmem:[%s535_s7 + $0x20] sm:$0xff] %v267_v40 }
 0x1c2   :  { %v269_v41 = vpop.f32.mrf.mxu2 }
 0x1c3   :  { %v270_v42 = vadd.f32 %v338_v30, %v269_v41 }
 0x1c5   :  { %283 = vst [vmem:[%s535_s7 + $0x28] sm:$0xff] %v270_v42 }
 0x1d0   :  { %v272_v43 = vpop.f32.mrf.mxu3 }
 0x1d1   :  { %v273_v44 = vadd.f32 %v338_v30, %v272_v43 }
 0x1d3   :  { %284 = vst [vmem:[%s535_s7 + $0x30] sm:$0xff] %v273_v44 }
 0x1d8   :  { %v275_v45 = vpop.f32.mrf.mxu3 }
 0x1d9   :  { %v276_v46 = vadd.f32 %v338_v30, %v275_v45 }
 0x1db   :  { %285 = vst [vmem:[%s535_s7 + $0x38] sm:$0xff] %v276_v46 }
 0x1dc   :  { %290 = vsyncpa [#allocation3], 1 }
 0x1dd   :  { %291 = vsyncpa [#allocation5], 1 }

</bundles_post_ra>
